<compile_context>
chip_gen: v7x
topology: tpu7x:2x2x1
jax: 0.10.0
libtpu: 0.0.40
codegen_flags: <defaults>
</compile_context>

<pallas_src>
import math

import jax
import jax.numpy as jnp
from jax.experimental import pallas as pl
from jax.experimental.pallas import tpu as pltpu

_MIB = 1024 * 1024


def _round_up(x, m):
    return ((x + m - 1) // m) * m


# --------------------------------------------------------------------------- #
# Kernel 1: support = X @ W   (row-tiled, bf16 at the MXU, f32 accumulate)
# --------------------------------------------------------------------------- #
def _xw_kernel(x_ref, w_ref, out_ref):
    out_ref[...] = jnp.dot(
        x_ref[...].astype(jnp.bfloat16), w_ref[...],
        preferred_element_type=jnp.float32,
    ).astype(out_ref.dtype)


# --------------------------------------------------------------------------- #
# Kernel 2a: out = A @ support + bias, support slab fully VMEM-resident
# --------------------------------------------------------------------------- #
def _aggregate_resident_kernel(adj_ref, sup_ref, b_ref, out_ref):
    k = pl.program_id(1)
    tk = adj_ref.shape[1]

    @pl.when(k == 0)
    def _():
        out_ref[...] = jnp.zeros_like(out_ref)

    start = pl.multiple_of(k * tk, tk)               # aligned slice of resident slab
    out_ref[...] += jnp.dot(
        adj_ref[...].astype(jnp.bfloat16),           # in-kernel cast: no pre-cast HBM pass
        sup_ref[pl.ds(start, tk), :],
        preferred_element_type=jnp.float32,
    )

    # Bias add once per output tile, in f32 (v5e VPU has no bf16).
    @pl.when(k == pl.num_programs(1) - 1)
    def _():
        out_ref[...] += b_ref[...]


# --------------------------------------------------------------------------- #
# Kernel 2b: huge-graph fallback, support streamed tile-by-tile
# --------------------------------------------------------------------------- #
def _aggregate_stream_kernel(adj_ref, sup_ref, b_ref, out_ref):
    k = pl.program_id(1)

    @pl.when(k == 0)
    def _():
        out_ref[...] = jnp.zeros_like(out_ref)

    out_ref[...] += jnp.dot(
        adj_ref[...].astype(jnp.bfloat16), sup_ref[...],
        preferred_element_type=jnp.float32,
    )

    @pl.when(k == pl.num_programs(1) - 1)
    def _():
        out_ref[...] += b_ref[...]


def graph_convolution(adjacency, x, weight, bias, *, tile_m=512, tile_k=1024):
    """L * X * Theta (+ bias) via two Pallas kernels (padded, tiled, bf16 MXU)."""
    n, d_in = x.shape
    d_out = weight.shape[1]

    base = _round_up(n, 128)
    tm = min(tile_m, base)                       # output-row tile
    tk = min(tile_k, base)                       # contraction tile (adjacency cols)
    n_pad = _round_up(n, math.lcm(tm, tk))       # pad N to the tile, not just 128
    d_in_pad = _round_up(d_in, 128)
    d_out_pad = _round_up(d_out, 128)

    # Adjacency / features stay f32 in HBM (cast to bf16 inside the kernels),
    # so the wrapper never does a full cast pass over the N^2 adjacency.
    f32 = jnp.float32
    adj_p = jnp.pad(adjacency.astype(f32), ((0, n_pad - n), (0, n_pad - n)))
    x_p = jnp.pad(x.astype(f32), ((0, n_pad - n), (0, d_in_pad - d_in)))
    w_p = jnp.pad(weight.astype(jnp.bfloat16),
                  ((0, d_in_pad - d_in), (0, d_out_pad - d_out)))
    b_p = jnp.pad(bias.astype(f32), (0, d_out_pad - d_out)).reshape(1, d_out_pad)

    # --- support = X @ W (computed once, kept lane-dense in bf16) ------------
    xw_vmem = (2 * tm * d_in_pad * 4            # x tiles (f32), double-buffered
               + d_in_pad * d_out_pad * 2       # resident weight (bf16)
               + 2 * tm * d_out_pad * 2)        # output tiles (bf16)
    support = pl.pallas_call(
        _xw_kernel,
        out_shape=jax.ShapeDtypeStruct((n_pad, d_out_pad), jnp.bfloat16),
        grid=(n_pad // tm,),
        in_specs=[
            pl.BlockSpec((tm, d_in_pad), lambda i: (i, 0)),
            pl.BlockSpec((d_in_pad, d_out_pad), lambda i: (0, 0)),   # weight resident
        ],
        out_specs=pl.BlockSpec((tm, d_out_pad), lambda i: (i, 0)),
        compiler_params=pltpu.CompilerParams(
            dimension_semantics=("parallel",),
            vmem_limit_bytes=int(min(max(2 * xw_vmem, 32 * _MIB), 64 * _MIB)),
        ),
        cost_estimate=pl.CostEstimate(
            flops=2 * n_pad * d_in_pad * d_out_pad,
            transcendentals=0,
            bytes_accessed=(n_pad * d_in_pad * 4 + d_in_pad * d_out_pad * 2
                            + n_pad * d_out_pad * 2),
        ),
    )(x_p, w_p)

    # --- out = A @ support + bias  (2-D grid: rows parallel, k arbitrary) ----
    support_bytes = n_pad * d_out_pad * 2
    resident = support_bytes <= 24 * _MIB        # fits even on v7x's 64 MiB VMEM

    if resident:
        kernel = _aggregate_resident_kernel
        tm_agg = tm
        sup_spec = pl.BlockSpec((n_pad, d_out_pad), lambda i, k: (0, 0))
        sup_vmem = 2 * support_bytes             # worst case: compiler double-buffers
        sup_read_bytes = support_bytes           # read from HBM exactly once
    else:
        # TODO(synk): huge-graph fallback re-streams support once per row tile;
        # a scalar-prefetch nonzero-block schedule is the real fix for sparse A.
        kernel = _aggregate_stream_kernel
        tm_agg = 1024 if n_pad % 1024 == 0 else tm
        sup_spec = pl.BlockSpec((tk, d_out_pad), lambda i, k: (k, 0))
        sup_vmem = 2 * tk * d_out_pad * 2
        sup_read_bytes = support_bytes * (n_pad // tm_agg)

    agg_vmem = (2 * tm_agg * tk * 4              # adjacency tiles (f32), double-buffered
                + sup_vmem
                + 2 * tm_agg * d_out_pad * 4     # output tiles (f32)
                + 2 * d_out_pad * 4)             # bias
    out_p = pl.pallas_call(
        kernel,
        out_shape=jax.ShapeDtypeStruct((n_pad, d_out_pad), jnp.float32),
        grid=(n_pad // tm_agg, n_pad // tk),
        in_specs=[
            pl.BlockSpec((tm_agg, tk), lambda i, k: (i, k)),     # adjacency streams
            sup_spec,                                            # resident (or streamed)
            pl.BlockSpec((1, d_out_pad), lambda i, k: (0, 0)),   # bias resident
        ],
        out_specs=pl.BlockSpec((tm_agg, d_out_pad), lambda i, k: (i, 0)),
        compiler_params=pltpu.CompilerParams(
            dimension_semantics=("parallel", "arbitrary"),
            vmem_limit_bytes=int(min(max(agg_vmem + 4 * _MIB, 32 * _MIB), 64 * _MIB)),
        ),
        cost_estimate=pl.CostEstimate(
            flops=2 * n_pad * n_pad * d_out_pad,
            transcendentals=0,
            bytes_accessed=(n_pad * n_pad * 4 + sup_read_bytes
                            + n_pad * d_out_pad * 4),
        ),
    )(adj_p, support, b_p)

    # Padded rows hold (0 + bias); the slice below removes them — keep it.
    return out_p[:n, :d_out]


def init_params(key, input_dim, output_dim):
    """Mimic GraphConvolution.reset_parameters deterministically.

    kaiming_uniform_ on a (input_dim, output_dim) tensor:
      fan_in = output_dim (PyTorch uses tensor.size(1) for 2-D),
      gain   = sqrt(2),
      bound  = gain * sqrt(3 / fan_in) = sqrt(6 / output_dim).
    bias is zero-initialized.
    """
    bound = math.sqrt(6.0 / output_dim)
    weight = jax.random.uniform(
        key, (input_dim, output_dim), dtype=jnp.float32, minval=-bound, maxval=bound
    )
    bias = jnp.zeros((output_dim,), dtype=jnp.float32)
    return weight, bias


if __name__ == "__main__":
    # Small shapes consistent with the module: N nodes, input_dim -> output_dim.
    N, D_IN, D_OUT = 64, 32, 16

    key = jax.random.PRNGKey(0)
    k_w, k_x, k_a = jax.random.split(key, 3)

    weight, bias = init_params(k_w, D_IN, D_OUT)
    x = jax.random.normal(k_x, (N, D_IN), dtype=jnp.float32)

    # Deterministic symmetric-normalized adjacency (dense stand-in for the
    # sparse normalized Laplacian L used by GCN on Cora).
    a_raw = (jax.random.uniform(k_a, (N, N)) > 0.8).astype(jnp.float32)
    a_sym = jnp.maximum(a_raw, a_raw.T) + jnp.eye(N, dtype=jnp.float32)
    deg = jnp.sum(a_sym, axis=1)
    d_inv_sqrt = 1.0 / jnp.sqrt(deg)
    adjacency = a_sym * d_inv_sqrt[:, None] * d_inv_sqrt[None, :]

    out = graph_convolution(adjacency, x, weight, bias)
    out = jax.block_until_ready(out)

    # Reference check against plain f32 JAX (tolerance loosened because the
    # kernels feed bf16 operands to the MXU with f32 accumulation).
    ref = adjacency @ (x @ weight) + bias[None, :]
    assert out.shape == (N, D_OUT)
    assert jnp.allclose(out, ref, atol=5e-2, rtol=5e-2), float(
        jnp.max(jnp.abs(out - ref)))

    print("KERNEL_OK")
</pallas_src>

<mosaic_0001>
module attributes {stable_mosaic.version = 11 : i64} {
  func.func @_xw_kernel(%arg0: i32, %arg1: memref<128x128xf32, #tpu.memory_space<vmem>>, %arg2: memref<128x128xbf16, #tpu.memory_space<vmem>>, %arg3: memref<128x128xbf16, #tpu.memory_space<vmem>>) attributes {dimension_semantics = [#tpu.dimension_semantics<parallel>], iteration_bounds = array<i64: 1>, scalar_prefetch = 0 : i64, scratch_operands = 0 : i64, tpu.core_type = #tpu.core_type<tc>, window_params = [{transform_indices = @transform_0, window_bounds = array<i64: 128, 128>}, {pipeline_mode = #tpu.pipeline_mode<synchronous>, transform_indices = @transform_1, window_bounds = array<i64: 128, 128>}, {transform_indices = @transform_2, window_bounds = array<i64: 128, 128>}]} {
    %c0 = arith.constant 0 : index
    %c0_0 = arith.constant 0 : index
    %0 = vector.load %arg1[%c0, %c0_0] : memref<128x128xf32, #tpu.memory_space<vmem>>, vector<128x128xf32>
    %1 = arith.truncf %0 : vector<128x128xf32> to vector<128x128xbf16>
    %c0_1 = arith.constant 0 : index
    %c0_2 = arith.constant 0 : index
    %2 = vector.load %arg2[%c0_1, %c0_2] : memref<128x128xbf16, #tpu.memory_space<vmem>>, vector<128x128xbf16>
    %cst = arith.constant dense<0.000000e+00> : vector<128x128xf32>
    %3 = tpu.matmul %1, %2, %cst {dimension_numbers = #tpu.dot_dimension_numbers<[1], [0], [0], [1], [0, 0, 1, 1], [], []>} : vector<128x128xbf16>, vector<128x128xbf16>, vector<128x128xf32> -> vector<128x128xf32>
    %4 = arith.truncf %3 : vector<128x128xf32> to vector<128x128xbf16>
    %c0_3 = arith.constant 0 : index
    %c0_4 = arith.constant 0 : index
    %5 = vector.load %arg3[%c0_3, %c0_4] : memref<128x128xbf16, #tpu.memory_space<vmem>>, vector<128x128xbf16>
    tpu.vector_store %arg3[%c0_3, %c0_4], %4 {strides = array<i32>} : memref<128x128xbf16, #tpu.memory_space<vmem>>, vector<128x128xbf16>,
    return
  }
  func.func @transform_0(%arg0: i32) -> (i32, i32) {
    %c0_i32 = arith.constant 0 : i32
    %c0_i32_0 = arith.constant 0 : i32
    return %arg0, %c0_i32 : i32, i32
  }
  func.func @transform_1(%arg0: i32) -> (i32, i32) {
    %c0_i32 = arith.constant 0 : i32
    %c0_i32_0 = arith.constant 0 : i32
    %c0_i32_1 = arith.constant 0 : i32
    return %c0_i32, %c0_i32_0 : i32, i32
  }
  func.func @transform_2(%arg0: i32) -> (i32, i32) {
    %c0_i32 = arith.constant 0 : i32
    %c0_i32_0 = arith.constant 0 : i32
    return %arg0, %c0_i32 : i32, i32
  }
}

</mosaic_0001>

<bundles_post_ra>
// kernel: tpu_custom_call.1
= control target key start
LH: loop header
LB: loop body
LE: loop exit
PB: predicated region body
PF: predicated region fallthrough
CT: control target
= control target key end

     0   :  { %7 = vsyncpa [#allocation3], 0  ;;  %s626_s0 = inlined_call_operand.hbm [shape: f32[128,128], index: 0, kind: input, shape index: {}]   ;;  %s627_s1 = inlined_call_operand.hbm [shape: bf16[128,128], index: 1, kind: input, shape index: {}]   ;;  %s628_s2 = inlined_call_operand.hbm [shape: bf16[128,128], index: 2, kind: output, shape index: {}]  }
   0x1   :  { %8 = vsyncpa [#allocation6], 0 }
   0x2   :  { %9 = vsyncpa [#allocation4], 0  ;;  %s562_s9 = smov [#allocation2]   ;;  %s490_s13 = scalar_lea.hbm %s626_s0, 2048 }
   0x3   :  { %s15_s10 = sshll.u32 %s562_s9, 4  ;;  %p491_p0 = scmp.ne.s32.totalorder %s626_s0, %s490_s13  ;;  %s16_s10 = int_to_ptr.vmem [resolvable:$true] %s15_s10 }
   0x4   :  { %p494_p1 = scmp.lt.u32.totalorder %s490_s13, %s626_s0 }
   0x6   :  { %p496_p2 = pnand %p494_p1, %p491_p0 }
   0x8   :  { %499 = shalt.err (!%p496_p2)
}
   0x9   :  { %s500_s18 = scalar_lea.vmem %s16_s10, 2048  ;;  %p505_p4 = scmp.lt.s32.totalorder %s16_s10, %s16_s10 }
   0xa   :  { %p501_p3 = scmp.ne.s32.totalorder %s16_s10, %s500_s18  ;;  %p506_p5 = scmp.lt.s32.totalorder %s500_s18, %s500_s18 }
   0xc   :  { %p507_p6 = por %p506_p5, %p505_p4 }
   0xe   :  { %p508_p7 = pnand %p507_p6, %p501_p3 }
  0x10   :  { %511 = shalt.err (!%p508_p7)
}
  0x11   :  { %s563_s19 = smov 128   ;;  %s564_s20 = smov 8  }
  0x12   :  { %21 = dma.hbm_to_vmem [thread:$0]  %s626_s0, 2048, %s16_s10, [#allocation3], %s563_s19, %s563_s19, %s564_s20  }
  0x13   :  { %s565_s23 = smov [#allocation5]   ;;  %s512_s27 = scalar_lea.hbm %s627_s1, 1024 }
  0x14   :  { %s27_s24 = sshll.u32 %s565_s23, 4  ;;  %p513_p8 = scmp.ne.s32.totalorder %s627_s1, %s512_s27  ;;  %s28_s24 = int_to_ptr.vmem [resolvable:$true] %s27_s24 }
  0x15   :  { %p516_p9 = scmp.lt.u32.totalorder %s512_s27, %s627_s1 }
  0x17   :  { %p518_p10 = pnand %p516_p9, %p513_p8 }
  0x19   :  { %521 = shalt.err (!%p518_p10)
}
  0x1a   :  { %s522_s4 = scalar_lea.vmem %s28_s24, 1024  ;;  %p527_p12 = scmp.lt.s32.totalorder %s28_s24, %s28_s24 }
  0x1b   :  { %p523_p11 = scmp.ne.s32.totalorder %s28_s24, %s522_s4  ;;  %p528_p13 = scmp.lt.s32.totalorder %s522_s4, %s522_s4 }
  0x1d   :  { %p529_p0 = por %p528_p13, %p527_p12 }
  0x1f   :  { %p530_p1 = pnand %p529_p0, %p523_p11 }
  0x21   :  { %533 = shalt.err (!%p530_p1)
}
  0x22   :  { %s566_s0 = smov 64   ;;  %s567_s5 = smov 4  }
  0x23   :  { %33 = dma.hbm_to_vmem [thread:$0]  %s627_s1, 1024, %s28_s24, [#allocation6], %s566_s0, %s566_s0, %s567_s5  }
  0x24   :  { %556 = dma.done.wait [#allocation3], 2048  }
  0x25   :  { %557 = vsyncadd [#allocation3], 4294965248 }
  0x26   :  { %558 = dma.done.wait [#allocation6], 1024  }
  0x27   :  { %559 = vsyncadd [#allocation6], 4294966272  ;;  %v482_v0 = vld [vmem:[#allocation5] sm:$0xff]   ;;  %v483_v1 = vld [vmem:[#allocation5 + $0x8] sm:$0xff]   ;;  %s568_s1 = smov [#allocation7]  }
  0x28   :  { %427 = vmatprep.subr.bf16.mxu0 %v482_v0  ;;  %459 = vmatprep.subr.bf16.mxu1 %v482_v0  ;;  %v484_v2 = vld [vmem:[#allocation5 + $0x10] sm:$0xff]   ;;  %v485_v3 = vld [vmem:[#allocation5 + $0x18] sm:$0xff]   ;;  %v41_v4 = vld [vmem:[#allocation2] sm:$0xff]  ;;  %s311_s8 = sshll.u32 %s568_s1, 4  ;;  %s312_s8 = int_to_ptr.vmem [resolvable:$true] %s311_s8 }
  0x29   :  { %428 = vmatpush3.bf16.msra.mxu0 %v482_v0  ;;  %467 = vmatpush3.bf16.msra.mxu1 %v482_v0  ;;  %v42_v5 = vld [vmem:[#allocation2 + $0x8] sm:$0xff]  ;;  %v49_v6 = vld [vmem:[#allocation2 + $0x40] sm:$0xff]  ;;  %v488_v12 = vld [vmem:[#allocation5 + $0x30] sm:$0xff]   ;;  %s534_s9 = scalar_lea.vmem %s312_s8, 1024  ;;  %p539_p3 = scmp.lt.s32.totalorder %s312_s8, %s312_s8 }
  0x2a   :  { %429 = vmatprep.subr.bf16.mxu0 %v483_v1  ;;  %460 = vmatprep.subr.bf16.mxu1 %v483_v1  ;;  %v57_v7 = vpack.c.bf16 %v42_v5, %v41_v4  ;;  %v50_v8 = vld [vmem:[#allocation2 + $0x48] sm:$0xff]  ;;  %v486_v10 = vld [vmem:[#allocation5 + $0x20] sm:$0xff]   ;;  %v489_v13 = vld [vmem:[#allocation5 + $0x38] sm:$0xff]   ;;  %p535_p2 = scmp.ne.s32.totalorder %s312_s8, %s534_s9  ;;  %p540_p4 = scmp.lt.s32.totalorder %s534_s9, %s534_s9 }
  0x2b   :  { %v61_v9 = vpack.c.bf16 %v50_v8, %v49_v6  ;;  %v487_v11 = vld [vmem:[#allocation5 + $0x28] sm:$0xff]   ;;  %v43_v14 = vld [vmem:[#allocation2 + $0x10] sm:$0xff]  ;;  %v44_v15 = vld [vmem:[#allocation2 + $0x18] sm:$0xff] }
  0x2c   :  { %443 = vmatprep.mubr.bf16.mxu0 %v57_v7  ;;  %v51_v16 = vld [vmem:[#allocation2 + $0x50] sm:$0xff]  ;;  %v52_v17 = vld [vmem:[#allocation2 + $0x58] sm:$0xff]  ;;  %v45_v18 = vld [vmem:[#allocation2 + $0x20] sm:$0xff]  ;;  %v58_v22 = vpack.c.bf16 %v44_v15, %v43_v14  ;;  %p541_p5 = por %p540_p4, %p539_p3 }
  0x2d   :  { %430 = vmatpush3.bf16.msra.mxu0 %v483_v1  ;;  %468 = vmatpush3.bf16.msra.mxu1 %v483_v1  ;;  %v46_v19 = vld [vmem:[#allocation2 + $0x28] sm:$0xff]  ;;  %v53_v20 = vld [vmem:[#allocation2 + $0x60] sm:$0xff]  ;;  %v62_v23 = vpack.c.bf16 %v52_v17, %v51_v16  ;;  %v47_v26 = vld [vmem:[#allocation2 + $0x30] sm:$0xff] }
  0x2e   :  { %431 = vmatprep.subr.bf16.mxu0 %v484_v2  ;;  %461 = vmatprep.subr.bf16.mxu1 %v484_v2  ;;  %v54_v21 = vld [vmem:[#allocation2 + $0x68] sm:$0xff]  ;;  %v59_v24 = vpack.c.bf16 %v46_v19, %v45_v18  ;;  %v48_v27 = vld [vmem:[#allocation2 + $0x38] sm:$0xff]  ;;  %v55_v28 = vld [vmem:[#allocation2 + $0x70] sm:$0xff]  ;;  %p542_p6 = pnand %p541_p5, %p535_p2 }
  0x2f   :  { %451 = vmatprep.mubr.bf16.mxu1 %v61_v9  ;;  %v63_v25 = vpack.c.bf16 %v54_v21, %v53_v20  ;;  %v56_v29 = vld [vmem:[#allocation2 + $0x78] sm:$0xff]  ;;  %v60_v30 = vpack.c.bf16 %v48_v27, %v47_v26 }
  0x30   :  { %v64_v31 = vpack.c.bf16 %v56_v29, %v55_v28 }
  0x31   :  { %432 = vmatpush3.bf16.msra.mxu0 %v484_v2  ;;  %469 = vmatpush3.bf16.msra.mxu1 %v484_v2 }
  0x32   :  { %433 = vmatprep.subr.bf16.mxu0 %v485_v3  ;;  %462 = vmatprep.subr.bf16.mxu1 %v485_v3 }
  0x35   :  { %434 = vmatpush3.bf16.msra.mxu0 %v485_v3  ;;  %470 = vmatpush3.bf16.msra.mxu1 %v485_v3 }
  0x36   :  { %435 = vmatprep.subr.bf16.mxu0 %v486_v10  ;;  %463 = vmatprep.subr.bf16.mxu1 %v486_v10 }
  0x39   :  { %436 = vmatpush3.bf16.msra.mxu0 %v486_v10  ;;  %471 = vmatpush3.bf16.msra.mxu1 %v486_v10 }
  0x3a   :  { %437 = vmatprep.subr.bf16.mxu0 %v487_v11  ;;  %464 = vmatprep.subr.bf16.mxu1 %v487_v11 }
  0x3d   :  { %438 = vmatpush3.bf16.msra.mxu0 %v487_v11  ;;  %472 = vmatpush3.bf16.msra.mxu1 %v487_v11 }
  0x3e   :  { %439 = vmatprep.subr.bf16.mxu0 %v488_v12  ;;  %465 = vmatprep.subr.bf16.mxu1 %v488_v12 }
  0x41   :  { %440 = vmatpush3.bf16.msra.mxu0 %v488_v12  ;;  %473 = vmatpush3.bf16.msra.mxu1 %v488_v12 }
  0x42   :  { %441 = vmatprep.subr.bf16.mxu0 %v489_v13  ;;  %466 = vmatprep.subr.bf16.mxu1 %v489_v13 }
  0x45   :  { %442 = vmatpush3.bf16.msra.mxu0 %v489_v13  ;;  %474 = vmatpush3.bf16.msra.mxu1 %v489_v13 }
  0x48   :  { %444 = vmatmul.mubr.bf16.vlgmr.msra.gmra.mrb[0].mxu0 %v58_v22  ;;  %452 = vmatmul.mubr.bf16.vlgmr.msra.gmra.mrb[0].mxu1 %v62_v23 }
  0x49   :  { %447 = vmatprep.mubr.bf16.mxu0 %v59_v24  ;;  %455 = vmatprep.mubr.bf16.mxu1 %v63_v25 }
  0x50   :  { %448 = vmatmul.mubr.bf16.gmra.mrb[4].mxu0 %v60_v30  ;;  %456 = vmatmul.mubr.bf16.gmra.mrb[4].mxu1 %v64_v31 }
 0x11b   :  { %v445_v32 = vpop.f32.mrb[0].mxu0  ;;  %v453_v33 = vpop.f32.mrb[0].mxu1 }
 0x11c   :  { %v163_v34 = vpop.f32.mrb[1].mxu0  ;;  %v195_v35 = vpop.f32.mrb[1].mxu1 }
 0x11d   :  { %v446_v36 = vpop.f32.mrb[2].mxu0  ;;  %v454_v37 = vpop.f32.mrb[2].mxu1 }
 0x11e   :  { %v372_v38 = vpack.c.bf16 %v446_v36, %v445_v32  ;;  %v392_v39 = vpack.c.bf16 %v454_v37, %v453_v33  ;;  %v166_v40 = vpop.f32.mrb[3].mxu0  ;;  %v198_v41 = vpop.f32.mrb[3].mxu1 }
 0x11f   :  { %v367_v42 = vpack.c.bf16 %v166_v40, %v163_v34  ;;  %v387_v43 = vpack.c.bf16 %v198_v41, %v195_v35 }
 0x120   :  { %404 = vst [vmem:[#allocation7 + $0x8] sm:$0xff] %v372_v38   ;;  %408 = vst [vmem:[#allocation7 + $0x28] sm:$0xff] %v392_v39  }
 0x121   :  { %368 = vst [vmem:[#allocation7] sm:$0xff] %v367_v42   ;;  %407 = vst [vmem:[#allocation7 + $0x20] sm:$0xff] %v387_v43  }
 0x123   :  { %v449_v44 = vpop.f32.mrb[4].mxu0  ;;  %v457_v45 = vpop.f32.mrb[4].mxu1 }
 0x124   :  { %v179_v46 = vpop.f32.mrb[5].mxu0  ;;  %v211_v47 = vpop.f32.mrb[5].mxu1 }
 0x125   :  { %v450_v48 = vpop.f32.mrb[6].mxu0  ;;  %v458_v49 = vpop.f32.mrb[6].mxu1 }
 0x126   :  { %v382_v50 = vpack.c.bf16 %v450_v48, %v449_v44  ;;  %v402_v51 = vpack.c.bf16 %v458_v49, %v457_v45  ;;  %v182_v52 = vpop.f32.mrb[7].mxu0  ;;  %v214_v53 = vpop.f32.mrb[7].mxu1 }
 0x127   :  { %v377_v54 = vpack.c.bf16 %v182_v52, %v179_v46  ;;  %v397_v55 = vpack.c.bf16 %v214_v53, %v211_v47 }
 0x128   :  { %406 = vst [vmem:[#allocation7 + $0x18] sm:$0xff] %v382_v50   ;;  %410 = vst [vmem:[#allocation7 + $0x38] sm:$0xff] %v402_v51  }
 0x129   :  { %405 = vst [vmem:[#allocation7 + $0x10] sm:$0xff] %v377_v54   ;;  %409 = vst [vmem:[#allocation7 + $0x30] sm:$0xff] %v397_v55  }
 0x12a   :  { %545 = shalt.err (!%p542_p6)
}
 0x12b   :  { %s546_s12 = scalar_lea.hbm %s628_s2, 1024 }
 0x12c   :  { %p547_p7 = scmp.ne.s32.totalorder %s628_s2, %s546_s12  ;;  %p550_p8 = scmp.lt.u32.totalorder %s546_s12, %s628_s2 }
 0x12e   :  { %p552_p9 = pnand %p550_p8, %p547_p7 }
 0x130   :  { %555 = shalt.err (!%p552_p9)
}
 0x131   :  { %317 = dma.vmem_to_hbm [thread:$0]  %s312_s8, 1024, %s628_s2, [#allocation4], %s566_s0, %s566_s0, %s567_s5  }
 0x132   :  { %560 = dma.done.wait [#allocation4], 1024  }
 0x133   :  { %561 = vsyncadd [#allocation4], 4294966272 }
 0x134   :  { %321 = vsyncpa [#allocation3], 1 }
 0x135   :  { %322 = vsyncpa [#allocation6], 1 }
 0x136   :  { %323 = vsyncpa [#allocation4], 1 }

</bundles_post_ra>
